<compile_context>
chip_gen: v5e
topology: v5e:2x2
jax: 0.10.0
libtpu: 0.0.40
codegen_flags: <defaults>
</compile_context>

<pallas_src>
import functools

import jax
import jax.numpy as jnp
from jax.experimental import pallas as pl
from jax.experimental.pallas import tpu as pltpu

HIDDEN = 10       # fixed by the module definition (fc1 -> 10 -> 10 -> output_dim)
H_PAD = 128       # lane-padded hidden width
MAX_TB = 512      # hard cap on batch-tile rows
X_TILE_BUDGET = 8 * 1024 * 1024   # target bytes for the double-buffered x tile


def _round_up(n, m):
    return ((n + m - 1) // m) * m


def _pick_batch_tile(b8, D):
    """Largest multiple-of-8 tile <= MAX_TB whose double-buffered x slab fits budget."""
    cap = max(8, (X_TILE_BUDGET // max(1, 2 * D * 4)) // 8 * 8)
    return max(8, min(b8, MAX_TB, cap))


def _mlp_kernel(x_ref, w1_ref, slab_ref, o_ref, *, o_pad):
    # fc1: the only matmul with a real contraction (K = C*H*W).  x is cast to
    # the (possibly bf16) weight dtype; accumulation stays f32 on the MXU.
    x = x_ref[...].astype(w1_ref.dtype)
    h = jnp.dot(x, w1_ref[...], preferred_element_type=jnp.float32)

    # Biases live in the sublane-aligned tail of the packed parameter slab
    # (rows 0/1/2 of this (8, lanes) block are b1/b2/b3, rest is zero padding).
    bias = slab_ref[2 * H_PAD:2 * H_PAD + 8, :]
    h = jnp.maximum(h + bias[0:1, :H_PAD], 0.0)          # fc1 bias + ReLU

    # fc2: (TB,128) @ (128,128) -- a single full MXU pass now that it's padded.
    h = jnp.dot(h, slab_ref[0:H_PAD, 0:H_PAD], preferred_element_type=jnp.float32)
    h = jnp.maximum(h + bias[1:2, :H_PAD], 0.0)          # fc2 bias + ReLU

    # fc3 (no activation); padded output columns stay exactly zero.
    h = jnp.dot(h, slab_ref[H_PAD:2 * H_PAD, 0:o_pad],
                preferred_element_type=jnp.float32)
    h = h + bias[2:3, :o_pad]
    o_ref[...] = h.astype(o_ref.dtype)


def small_layer_concept_forward(x, params, *, fc1_bf16=False):
    """x: (B, C, H, W) float32 (NCHW).  Returns (B, output_dim) float32."""
    w1, b1, w2, b2, w3, b3 = params
    B = x.shape[0]
    x_flat = x.reshape(B, -1)                 # matches torch x.view(B, -1)
    D = x_flat.shape[1]
    O = w3.shape[1]

    o_pad = _round_up(O, 128)                 # lane-dense output width
    w_slab = max(H_PAD, o_pad)                # slab lane width (== o_pad)

    # Sublane-pad the batch (>= 8 rows) and pick a VMEM-friendly tile.
    b8 = max(_round_up(B, 8), 8)
    tb = _pick_batch_tile(b8, D)
    b_pad = _round_up(b8, tb)
    if b_pad != B:
        x_flat = jnp.pad(x_flat, ((0, b_pad - B), (0, 0)))

    # Lane-pad fc1 weight; optional bf16 pre-cast (main compute/bandwidth lever
    # on v6e/v7x at large batch; keep f32 by default for exact torch semantics).
    w1_p = jnp.zeros((D, H_PAD), jnp.float32).at[:, :HIDDEN].set(w1)
    if fc1_bf16:
        w1_p = w1_p.astype(jnp.bfloat16)

    # Pack fc2 weight, fc3 weight and all three biases into one slab:
    #   rows [0,128)        -> w2 (10x10, zero-padded)
    #   rows [128,256)      -> w3 (10xO, zero-padded)
    #   rows [256,264)      -> b1 / b2 / b3 (one bias per sublane row)
    slab = jnp.zeros((2 * H_PAD + 8, w_slab), jnp.float32)
    slab = slab.at[:HIDDEN, :HIDDEN].set(w2)
    slab = slab.at[H_PAD:H_PAD + HIDDEN, :O].set(w3)
    slab = slab.at[2 * H_PAD + 0, :HIDDEN].set(b1.reshape(-1))
    slab = slab.at[2 * H_PAD + 1, :HIDDEN].set(b2.reshape(-1))
    slab = slab.at[2 * H_PAD + 2, :O].set(b3.reshape(-1))

    kernel = functools.partial(_mlp_kernel, o_pad=o_pad)

    # Rough double-buffered working-set estimate; only raise the scoped VMEM
    # limit when the default (16/32 MiB) would not cover it.
    w1_bytes = 2 if fc1_bf16 else 4
    est_vmem = (2 * tb * D * 4 + 2 * D * H_PAD * w1_bytes
                + 2 * (2 * H_PAD + 8) * w_slab * 4 + 2 * tb * o_pad * 4)
    compiler_kwargs = dict(dimension_semantics=("parallel",))
    if est_vmem > 24 * 1024 * 1024:
        compiler_kwargs["vmem_limit_bytes"] = min(int(est_vmem * 1.25),
                                                  100 * 1024 * 1024)
    # TODO(synk): if D ever gets huge (e.g. raw 3x224x224 images), also tile the
    # fc1 contraction axis with an f32 accumulator instead of keeping w1 resident.

    out_padded = pl.pallas_call(
        kernel,
        out_shape=jax.ShapeDtypeStruct((b_pad, o_pad), jnp.float32),
        grid_spec=pltpu.PrefetchScalarGridSpec(
            num_scalar_prefetch=0,
            grid=(b_pad // tb,),
            in_specs=[
                pl.BlockSpec((tb, D), lambda i: (i, 0)),                  # x tile
                pl.BlockSpec((D, H_PAD), lambda i: (0, 0)),               # w1 (resident)
                pl.BlockSpec((2 * H_PAD + 8, w_slab), lambda i: (0, 0)),  # packed params
            ],
            out_specs=pl.BlockSpec((tb, o_pad), lambda i: (i, 0)),
        ),
        compiler_params=pltpu.CompilerParams(**compiler_kwargs),
    )(x_flat, w1_p, slab)

    return out_padded[:B, :O]


def init_params(key, input_dim, output_dim):
    """Deterministic synthetic parameters; shapes follow nn.Linear.
    Stored as (in, out) so the kernel computes x @ W + b."""
    ks = jax.random.split(key, 6)
    scale = lambda fan_in: 1.0 / jnp.sqrt(jnp.float32(fan_in))
    w1 = jax.random.uniform(ks[0], (input_dim, HIDDEN), jnp.float32, -1, 1) * scale(input_dim)
    b1 = jax.random.uniform(ks[1], (1, HIDDEN), jnp.float32, -1, 1) * scale(input_dim)
    w2 = jax.random.uniform(ks[2], (HIDDEN, HIDDEN), jnp.float32, -1, 1) * scale(HIDDEN)
    b2 = jax.random.uniform(ks[3], (1, HIDDEN), jnp.float32, -1, 1) * scale(HIDDEN)
    w3 = jax.random.uniform(ks[4], (HIDDEN, output_dim), jnp.float32, -1, 1) * scale(HIDDEN)
    b3 = jax.random.uniform(ks[5], (1, output_dim), jnp.float32, -1, 1) * scale(HIDDEN)
    return (w1, b1, w2, b2, w3, b3)


def _reference(x, params):
    w1, b1, w2, b2, w3, b3 = params
    h = x.reshape(x.shape[0], -1)
    h = jnp.maximum(h @ w1 + b1, 0.0)
    h = jnp.maximum(h @ w2 + b2, 0.0)
    return h @ w3 + b3


if __name__ == "__main__":
    key = jax.random.PRNGKey(0)
    k_x, k_p = jax.random.split(key)

    B, C, H, W = 2, 4, 16, 16          # input_dim = C*H*W = 1024
    output_dim = 5

    x = jax.random.normal(k_x, (B, C, H, W), dtype=jnp.float32)
    params = init_params(k_p, C * H * W, output_dim)

    out = small_layer_concept_forward(x, params)   # exact-f32 path
    out = jax.block_until_ready(out)

    ref = _reference(x, params)
    assert out.shape == (B, output_dim)
    assert jnp.allclose(out, ref, atol=1e-4, rtol=1e-4)

    print("KERNEL_OK")
</pallas_src>

<mosaic_0001>
module attributes {stable_mosaic.version = 11 : i64} {
  func.func @_mlp_kernel(%arg0: i32, %arg1: memref<8x1024xf32, #tpu.memory_space<vmem>>, %arg2: memref<1024x128xf32, #tpu.memory_space<vmem>>, %arg3: memref<264x128xf32, #tpu.memory_space<vmem>>, %arg4: memref<8x128xf32, #tpu.memory_space<vmem>>) attributes {dimension_semantics = [#tpu.dimension_semantics<parallel>], iteration_bounds = array<i64: 1>, scalar_prefetch = 0 : i64, scratch_operands = 0 : i64, tpu.core_type = #tpu.core_type<tc>, window_params = [{transform_indices = @transform_0, window_bounds = array<i64: 8, 1024>}, {pipeline_mode = #tpu.pipeline_mode<synchronous>, transform_indices = @transform_1, window_bounds = array<i64: 1024, 128>}, {pipeline_mode = #tpu.pipeline_mode<synchronous>, transform_indices = @transform_2, window_bounds = array<i64: 264, 128>}, {transform_indices = @transform_3, window_bounds = array<i64: 8, 128>}]} {
    %c0 = arith.constant 0 : index
    %c0_0 = arith.constant 0 : index
    %0 = vector.load %arg1[%c0, %c0_0] : memref<8x1024xf32, #tpu.memory_space<vmem>>, vector<8x1024xf32>
    %c0_1 = arith.constant 0 : index
    %c0_2 = arith.constant 0 : index
    %1 = vector.load %arg2[%c0_1, %c0_2] : memref<1024x128xf32, #tpu.memory_space<vmem>>, vector<1024x128xf32>
    %cst = arith.constant dense<0.000000e+00> : vector<8x128xf32>
    %2 = tpu.matmul %0, %1, %cst {dimension_numbers = #tpu.dot_dimension_numbers<[1], [0], [0], [1], [0, 0, 1, 1], [], []>} : vector<8x1024xf32>, vector<1024x128xf32>, vector<8x128xf32> -> vector<8x128xf32>
    %c256 = arith.constant 256 : index
    %c0_3 = arith.constant 0 : index
    %3 = vector.load %arg3[%c256, %c0_3] : memref<264x128xf32, #tpu.memory_space<vmem>>, vector<8x128xf32>
    %4 = vector.extract_strided_slice %3 {offsets = [0, 0], sizes = [1, 128], strides = [1, 1]} : vector<8x128xf32> to vector<1x128xf32>
    %5 = vector.broadcast %4 : vector<1x128xf32> to vector<8x128xf32>
    %6 = arith.addf %2, %5 : vector<8x128xf32>
    %cst_4 = arith.constant 0.000000e+00 : f32
    %7 = vector.broadcast %cst_4 : f32 to vector<8x128xf32>
    %8 = arith.maximumf %6, %7 : vector<8x128xf32>
    %c0_5 = arith.constant 0 : index
    %c0_6 = arith.constant 0 : index
    %9 = vector.load %arg3[%c0_5, %c0_6] : memref<264x128xf32, #tpu.memory_space<vmem>>, vector<128x128xf32>
    %cst_7 = arith.constant dense<0.000000e+00> : vector<8x128xf32>
    %10 = tpu.matmul %8, %9, %cst_7 {dimension_numbers = #tpu.dot_dimension_numbers<[1], [0], [0], [1], [0, 0, 1, 1], [], []>} : vector<8x128xf32>, vector<128x128xf32>, vector<8x128xf32> -> vector<8x128xf32>
    %11 = vector.extract_strided_slice %3 {offsets = [1, 0], sizes = [1, 128], strides = [1, 1]} : vector<8x128xf32> to vector<1x128xf32>
    %12 = vector.broadcast %11 : vector<1x128xf32> to vector<8x128xf32>
    %13 = arith.addf %10, %12 : vector<8x128xf32>
    %cst_8 = arith.constant 0.000000e+00 : f32
    %14 = vector.broadcast %cst_8 : f32 to vector<8x128xf32>
    %15 = arith.maximumf %13, %14 : vector<8x128xf32>
    %c128 = arith.constant 128 : index
    %c0_9 = arith.constant 0 : index
    %16 = vector.load %arg3[%c128, %c0_9] : memref<264x128xf32, #tpu.memory_space<vmem>>, vector<128x128xf32>
    %cst_10 = arith.constant dense<0.000000e+00> : vector<8x128xf32>
    %17 = tpu.matmul %15, %16, %cst_10 {dimension_numbers = #tpu.dot_dimension_numbers<[1], [0], [0], [1], [0, 0, 1, 1], [], []>} : vector<8x128xf32>, vector<128x128xf32>, vector<8x128xf32> -> vector<8x128xf32>
    %18 = vector.extract_strided_slice %3 {offsets = [2, 0], sizes = [1, 128], strides = [1, 1]} : vector<8x128xf32> to vector<1x128xf32>
    %19 = vector.broadcast %18 : vector<1x128xf32> to vector<8x128xf32>
    %20 = arith.addf %17, %19 : vector<8x128xf32>
    %c0_11 = arith.constant 0 : index
    %c0_12 = arith.constant 0 : index
    %21 = vector.load %arg4[%c0_11, %c0_12] : memref<8x128xf32, #tpu.memory_space<vmem>>, vector<8x128xf32>
    tpu.vector_store %arg4[%c0_11, %c0_12], %20 {strides = array<i32>} : memref<8x128xf32, #tpu.memory_space<vmem>>, vector<8x128xf32>,
    return
  }
  func.func @transform_0(%arg0: i32) -> (i32, i32) {
    %c0_i32 = arith.constant 0 : i32
    %c0_i32_0 = arith.constant 0 : i32
    return %arg0, %c0_i32 : i32, i32
  }
  func.func @transform_1(%arg0: i32) -> (i32, i32) {
    %c0_i32 = arith.constant 0 : i32
    %c0_i32_0 = arith.constant 0 : i32
    %c0_i32_1 = arith.constant 0 : i32
    return %c0_i32, %c0_i32_0 : i32, i32
  }
  func.func @transform_2(%arg0: i32) -> (i32, i32) {
    %c0_i32 = arith.constant 0 : i32
    %c0_i32_0 = arith.constant 0 : i32
    %c0_i32_1 = arith.constant 0 : i32
    return %c0_i32, %c0_i32_0 : i32, i32
  }
  func.func @transform_3(%arg0: i32) -> (i32, i32) {
    %c0_i32 = arith.constant 0 : i32
    %c0_i32_0 = arith.constant 0 : i32
    return %arg0, %c0_i32 : i32, i32
  }
}

</mosaic_0001>

<bundles_post_ra>
// kernel: tpu_custom_call.1
= control target key start
LH: loop header
LB: loop body
LE: loop exit
PB: predicated region body
PF: predicated region fallthrough
CT: control target
= control target key end

     0   :  { %8 = vsyncpa [#allocation3], 0  ;;  %s599_s0 = inlined_call_operand.hbm [shape: f32[8,1024], index: 0, kind: input, shape index: {}]   ;;  %s600_s1 = inlined_call_operand.hbm [shape: f32[1024,128], index: 1, kind: input, shape index: {}]   ;;  %s601_s2 = inlined_call_operand.hbm [shape: f32[264,128], index: 2, kind: input, shape index: {}]   ;;  %s602_s3 = inlined_call_operand.hbm [shape: f32[8,128], index: 3, kind: output, shape index: {}]  }
   0x1   :  { %9 = vsyncpa [#allocation6], 0  ;;  %s26_s14 = sshll.u32 %s600_s1, 4  ;;  %s27_s14 = int_to_ptr.hbm [resolvable:$true] %s26_s14 }
   0x2   :  { %10 = vsyncpa [#allocation4], 0  ;;  %s561_s15 = smov [#allocation5]   ;;  %s16_s19 = sshll.u32 %s599_s0, 4  ;;  %s17_s19 = int_to_ptr.hbm [resolvable:$true] %s16_s19 }
   0x3   :  { %s28_s16 = sshll.u32 %s561_s15, 4  ;;  %s562_s20 = smov 128   ;;  %s29_s16 = int_to_ptr.vmem [resolvable:$true] %s28_s16 }
   0x4   :  { %s563_s21 = smov 8   ;;  %s564_s22 = smov [#allocation2]  }
   0x5   :  { %34 = dma.hbm_to_vmem [thread:$0]  %s27_s14, 16384, %s29_s16, [#allocation6], %s562_s20, %s562_s20, %s563_s21  }
   0x6   :  { %s18_s23 = sshll.u32 %s564_s22, 4  ;;  %s39_s26 = sshll.u32 %s601_s2, 4  ;;  %s19_s23 = int_to_ptr.vmem [resolvable:$true] %s18_s23  ;;  %s40_s26 = int_to_ptr.hbm [resolvable:$true] %s39_s26 }
   0x7   :  { %21 = dma.hbm_to_vmem [thread:$0]  %s17_s19, 1024, %s19_s23, [#allocation3]  }
   0x8   :  { %s565_s1 = smov [#allocation7]  }
   0x9   :  { %s41_s27 = sshll.u32 %s565_s1, 4  ;;  %s42_s27 = int_to_ptr.vmem [resolvable:$true] %s41_s27 }
   0xa   :  { %47 = dma.hbm_to_vmem [thread:$0]  %s40_s26, 4224, %s42_s27, [#allocation6], %s562_s20, %s562_s20, %s563_s21  }
   0xb   :  { %555 = dma.done.wait [#allocation3], 1024  }
   0xc   :  { %556 = vsyncadd [#allocation3], 4294966272 }
   0xd   :  { %557 = dma.done.wait [#allocation6], 20608  }
   0xe   :  { %558 = vsyncadd [#allocation6], 4294946688  ;;  %v115_v0 = vld [vmem:[#allocation5 + $0x178] sm:$0xff]  ;;  %v114_v2 = vld [vmem:[#allocation5 + $0x170] sm:$0xff]  ;;  %s566_s0 = smov [#allocation8]   ;;  %s442_s30 = sshll.u32 %s602_s3, 4  ;;  %s443_s30 = int_to_ptr.hbm [resolvable:$true] %s442_s30 }
   0xf   :  { %v83_v1 = vld [vmem:[#allocation5 + $0x78] sm:$0xff]  ;;  %238 = vmatpush.msra.mxu2 %v115_v0  ;;  %v82_v4 = vld [vmem:[#allocation5 + $0x70] sm:$0xff]  ;;  %v113_v6 = vld [vmem:[#allocation5 + $0x168] sm:$0xff]  ;;  %s440_s2 = sshll.u32 %s566_s0, 4  ;;  %s441_s2 = int_to_ptr.vmem [resolvable:$true] %s440_s2 }
  0x10   :  { %198 = vmatpush.msra.mxu0 %v83_v1  ;;  %v131_v3 = vld [vmem:[#allocation5 + $0x1f8] sm:$0xff]  ;;  %v130_v7 = vld [vmem:[#allocation5 + $0x1f0] sm:$0xff]  ;;  %v81_v8 = vld [vmem:[#allocation5 + $0x68] sm:$0xff] }
  0x11   :  { %v99_v5 = vld [vmem:[#allocation5 + $0xf8] sm:$0xff]  ;;  %258 = vmatpush.msra.mxu3 %v131_v3  ;;  %239 = vmatpush.msra.mxu2 %v114_v2  ;;  %v98_v9 = vld [vmem:[#allocation5 + $0xf0] sm:$0xff]  ;;  %v129_v10 = vld [vmem:[#allocation5 + $0x1e8] sm:$0xff] }
  0x12   :  { %218 = vmatpush.msra.mxu1 %v99_v5  ;;  %199 = vmatpush.msra.mxu0 %v82_v4  ;;  %v112_v11 = vld [vmem:[#allocation5 + $0x160] sm:$0xff]  ;;  %v97_v13 = vld [vmem:[#allocation5 + $0xe8] sm:$0xff]  ;;  %v111_v16 = vld [vmem:[#allocation5 + $0x158] sm:$0xff] }
  0x13   :  { %259 = vmatpush.msra.mxu3 %v130_v7  ;;  %v80_v12 = vld [vmem:[#allocation5 + $0x60] sm:$0xff]  ;;  %240 = vmatpush.msra.mxu2 %v113_v6  ;;  %v79_v17 = vld [vmem:[#allocation5 + $0x58] sm:$0xff]  ;;  %v110_v20 = vld [vmem:[#allocation5 + $0x150] sm:$0xff] }
  0x14   :  { %219 = vmatpush.msra.mxu1 %v98_v9  ;;  %200 = vmatpush.msra.mxu0 %v81_v8  ;;  %v128_v14 = vld [vmem:[#allocation5 + $0x1e0] sm:$0xff]  ;;  %v127_v18 = vld [vmem:[#allocation5 + $0x1d8] sm:$0xff]  ;;  %v78_v21 = vld [vmem:[#allocation5 + $0x50] sm:$0xff] }
  0x15   :  { %v96_v15 = vld [vmem:[#allocation5 + $0xe0] sm:$0xff]  ;;  %260 = vmatpush.msra.mxu3 %v129_v10  ;;  %241 = vmatpush.msra.mxu2 %v112_v11  ;;  %v95_v19 = vld [vmem:[#allocation5 + $0xd8] sm:$0xff]  ;;  %v126_v22 = vld [vmem:[#allocation5 + $0x1d0] sm:$0xff] }
  0x16   :  { %220 = vmatpush.msra.mxu1 %v97_v13  ;;  %201 = vmatpush.msra.mxu0 %v80_v12  ;;  %v94_v23 = vld [vmem:[#allocation5 + $0xd0] sm:$0xff]  ;;  %v109_v24 = vld [vmem:[#allocation5 + $0x148] sm:$0xff]  ;;  %v108_v28 = vld [vmem:[#allocation5 + $0x140] sm:$0xff] }
  0x17   :  { %261 = vmatpush.msra.mxu3 %v128_v14  ;;  %242 = vmatpush.msra.mxu2 %v111_v16  ;;  %v77_v25 = vld [vmem:[#allocation5 + $0x48] sm:$0xff]  ;;  %v76_v29 = vld [vmem:[#allocation5 + $0x40] sm:$0xff]  ;;  %v107_v32 = vld [vmem:[#allocation5 + $0x138] sm:$0xff] }
  0x18   :  { %221 = vmatpush.msra.mxu1 %v96_v15  ;;  %202 = vmatpush.msra.mxu0 %v79_v17  ;;  %v125_v26 = vld [vmem:[#allocation5 + $0x1c8] sm:$0xff]  ;;  %v124_v30 = vld [vmem:[#allocation5 + $0x1c0] sm:$0xff]  ;;  %v75_v33 = vld [vmem:[#allocation5 + $0x38] sm:$0xff] }
  0x19   :  { %262 = vmatpush.msra.mxu3 %v127_v18  ;;  %243 = vmatpush.msra.mxu2 %v110_v20  ;;  %v93_v27 = vld [vmem:[#allocation5 + $0xc8] sm:$0xff]  ;;  %v92_v31 = vld [vmem:[#allocation5 + $0xc0] sm:$0xff]  ;;  %v123_v34 = vld [vmem:[#allocation5 + $0x1b8] sm:$0xff] }
  0x1a   :  { %222 = vmatpush.msra.mxu1 %v95_v19  ;;  %203 = vmatpush.msra.mxu0 %v78_v21  ;;  %v91_v35 = vld [vmem:[#allocation5 + $0xb8] sm:$0xff]  ;;  %v106_v36 = vld [vmem:[#allocation5 + $0x130] sm:$0xff]  ;;  %v105_v40 = vld [vmem:[#allocation5 + $0x128] sm:$0xff] }
  0x1b   :  { %263 = vmatpush.msra.mxu3 %v126_v22  ;;  %244 = vmatpush.msra.mxu2 %v109_v24  ;;  %v74_v37 = vld [vmem:[#allocation5 + $0x30] sm:$0xff]  ;;  %v73_v41 = vld [vmem:[#allocation5 + $0x28] sm:$0xff]  ;;  %v104_v44 = vld [vmem:[#allocation5 + $0x120] sm:$0xff] }
  0x1c   :  { %223 = vmatpush.msra.mxu1 %v94_v23  ;;  %204 = vmatpush.msra.mxu0 %v77_v25  ;;  %v122_v38 = vld [vmem:[#allocation5 + $0x1b0] sm:$0xff]  ;;  %v121_v42 = vld [vmem:[#allocation5 + $0x1a8] sm:$0xff]  ;;  %v72_v45 = vld [vmem:[#allocation5 + $0x20] sm:$0xff] }
  0x1d   :  { %264 = vmatpush.msra.mxu3 %v125_v26  ;;  %245 = vmatpush.msra.mxu2 %v108_v28  ;;  %v90_v39 = vld [vmem:[#allocation5 + $0xb0] sm:$0xff]  ;;  %v89_v43 = vld [vmem:[#allocation5 + $0xa8] sm:$0xff]  ;;  %v120_v46 = vld [vmem:[#allocation5 + $0x1a0] sm:$0xff] }
  0x1e   :  { %224 = vmatpush.msra.mxu1 %v93_v27  ;;  %205 = vmatpush.msra.mxu0 %v76_v29  ;;  %v88_v47 = vld [vmem:[#allocation5 + $0xa0] sm:$0xff]  ;;  %v103_v48 = vld [vmem:[#allocation5 + $0x118] sm:$0xff]  ;;  %v102_v52 = vld [vmem:[#allocation5 + $0x110] sm:$0xff] }
  0x1f   :  { %265 = vmatpush.msra.mxu3 %v124_v30  ;;  %246 = vmatpush.msra.mxu2 %v107_v32  ;;  %v71_v49 = vld [vmem:[#allocation5 + $0x18] sm:$0xff]  ;;  %v70_v53 = vld [vmem:[#allocation5 + $0x10] sm:$0xff]  ;;  %v101_v56 = vld [vmem:[#allocation5 + $0x108] sm:$0xff] }
  0x20   :  { %225 = vmatpush.msra.mxu1 %v92_v31  ;;  %206 = vmatpush.msra.mxu0 %v75_v33  ;;  %v119_v50 = vld [vmem:[#allocation5 + $0x198] sm:$0xff]  ;;  %v118_v54 = vld [vmem:[#allocation5 + $0x190] sm:$0xff]  ;;  %v69_v57 = vld [vmem:[#allocation5 + $0x8] sm:$0xff] }
  0x21   :  { %266 = vmatpush.msra.mxu3 %v123_v34  ;;  %247 = vmatpush.msra.mxu2 %v106_v36  ;;  %v87_v51 = vld [vmem:[#allocation5 + $0x98] sm:$0xff]  ;;  %v86_v55 = vld [vmem:[#allocation5 + $0x90] sm:$0xff]  ;;  %v117_v58 = vld [vmem:[#allocation5 + $0x188] sm:$0xff] }
  0x22   :  { %226 = vmatpush.msra.mxu1 %v91_v35  ;;  %207 = vmatpush.msra.mxu0 %v74_v37  ;;  %v85_v59 = vld [vmem:[#allocation5 + $0x88] sm:$0xff]  ;;  %v100_v60 = vld [vmem:[#allocation5 + $0x100] sm:$0xff]  ;;  %v179_v62 = vld [vmem:[#allocation5 + $0x378] sm:$0xff] }
  0x23   :  { %267 = vmatpush.msra.mxu3 %v122_v38  ;;  %248 = vmatpush.msra.mxu2 %v105_v40  ;;  %v68_v61 = vld [vmem:[#allocation5] sm:$0xff]  ;;  %v147_v0 = vld [vmem:[#allocation5 + $0x278] sm:$0xff]  ;;  %v178_v2 = vld [vmem:[#allocation5 + $0x370] sm:$0xff] }
  0x24   :  { %227 = vmatpush.msra.mxu1 %v90_v39  ;;  %208 = vmatpush.msra.mxu0 %v73_v41  ;;  %v116_v63 = vld [vmem:[#allocation5 + $0x180] sm:$0xff]  ;;  %v195_v1 = vld [vmem:[#allocation5 + $0x3f8] sm:$0xff]  ;;  %v146_v4 = vld [vmem:[#allocation5 + $0x270] sm:$0xff] }
  0x25   :  { %268 = vmatpush.msra.mxu3 %v121_v42  ;;  %249 = vmatpush.msra.mxu2 %v104_v44  ;;  %v84_v3 = vld [vmem:[#allocation5 + $0x80] sm:$0xff]  ;;  %v163_v5 = vld [vmem:[#allocation5 + $0x2f8] sm:$0xff]  ;;  %v177_v6 = vld [vmem:[#allocation5 + $0x368] sm:$0xff] }
  0x26   :  { %228 = vmatpush.msra.mxu1 %v89_v43  ;;  %209 = vmatpush.msra.mxu0 %v72_v45  ;;  %v194_v7 = vld [vmem:[#allocation5 + $0x3f0] sm:$0xff]  ;;  %v145_v8 = vld [vmem:[#allocation5 + $0x268] sm:$0xff]  ;;  %v176_v10 = vld [vmem:[#allocation5 + $0x360] sm:$0xff] }
  0x27   :  { %269 = vmatpush.msra.mxu3 %v120_v46  ;;  %250 = vmatpush.msra.mxu2 %v103_v48  ;;  %v162_v9 = vld [vmem:[#allocation5 + $0x2f0] sm:$0xff]  ;;  %v193_v11 = vld [vmem:[#allocation5 + $0x3e8] sm:$0xff]  ;;  %v144_v12 = vld [vmem:[#allocation5 + $0x260] sm:$0xff] }
  0x28   :  { %229 = vmatpush.msra.mxu1 %v88_v47  ;;  %210 = vmatpush.msra.mxu0 %v71_v49  ;;  %v161_v13 = vld [vmem:[#allocation5 + $0x2e8] sm:$0xff]  ;;  %v175_v14 = vld [vmem:[#allocation5 + $0x358] sm:$0xff]  ;;  %v192_v15 = vld [vmem:[#allocation5 + $0x3e0] sm:$0xff] }
  0x29   :  { %270 = vmatpush.msra.mxu3 %v119_v50  ;;  %251 = vmatpush.msra.mxu2 %v102_v52  ;;  %v143_v16 = vld [vmem:[#allocation5 + $0x258] sm:$0xff]  ;;  %v160_v17 = vld [vmem:[#allocation5 + $0x2e0] sm:$0xff]  ;;  %v174_v18 = vld [vmem:[#allocation5 + $0x350] sm:$0xff] }
  0x2a   :  { %230 = vmatpush.msra.mxu1 %v87_v51  ;;  %211 = vmatpush.msra.mxu0 %v70_v53  ;;  %v191_v19 = vld [vmem:[#allocation5 + $0x3d8] sm:$0xff]  ;;  %v142_v20 = vld [vmem:[#allocation5 + $0x250] sm:$0xff]  ;;  %v173_v22 = vld [vmem:[#allocation5 + $0x348] sm:$0xff] }
  0x2b   :  { %271 = vmatpush.msra.mxu3 %v118_v54  ;;  %252 = vmatpush.msra.mxu2 %v101_v56  ;;  %v159_v21 = vld [vmem:[#allocation5 + $0x2d8] sm:$0xff]  ;;  %v190_v23 = vld [vmem:[#allocation5 + $0x3d0] sm:$0xff]  ;;  %v141_v24 = vld [vmem:[#allocation5 + $0x248] sm:$0xff] }
  0x2c   :  { %231 = vmatpush.msra.mxu1 %v86_v55  ;;  %212 = vmatpush.msra.mxu0 %v69_v57  ;;  %v158_v25 = vld [vmem:[#allocation5 + $0x2d0] sm:$0xff]  ;;  %v172_v26 = vld [vmem:[#allocation5 + $0x340] sm:$0xff]  ;;  %v189_v27 = vld [vmem:[#allocation5 + $0x3c8] sm:$0xff] }
  0x2d   :  { %272 = vmatpush.msra.mxu3 %v117_v58  ;;  %253 = vmatpush.msra.mxu2 %v100_v60  ;;  %v140_v28 = vld [vmem:[#allocation5 + $0x240] sm:$0xff]  ;;  %v157_v29 = vld [vmem:[#allocation5 + $0x2c8] sm:$0xff]  ;;  %v171_v30 = vld [vmem:[#allocation5 + $0x338] sm:$0xff] }
  0x2e   :  { %232 = vmatpush.msra.mxu1 %v85_v59  ;;  %213 = vmatpush.msra.mxu0 %v68_v61  ;;  %v188_v31 = vld [vmem:[#allocation5 + $0x3c0] sm:$0xff]  ;;  %v139_v32 = vld [vmem:[#allocation5 + $0x238] sm:$0xff]  ;;  %v170_v34 = vld [vmem:[#allocation5 + $0x330] sm:$0xff] }
  0x2f   :  { %318 = vmatpush.msrb.mxu2 %v179_v62  ;;  %273 = vmatpush.msra.mxu3 %v116_v63  ;;  %v156_v33 = vld [vmem:[#allocation5 + $0x2c0] sm:$0xff]  ;;  %v187_v35 = vld [vmem:[#allocation5 + $0x3b8] sm:$0xff]  ;;  %v138_v36 = vld [vmem:[#allocation5 + $0x230] sm:$0xff] }
  0x30   :  { %278 = vmatpush.msrb.mxu0 %v147_v0  ;;  %233 = vmatpush.msra.mxu1 %v84_v3  ;;  %v155_v37 = vld [vmem:[#allocation5 + $0x2b8] sm:$0xff]  ;;  %v169_v38 = vld [vmem:[#allocation5 + $0x328] sm:$0xff]  ;;  %v186_v39 = vld [vmem:[#allocation5 + $0x3b0] sm:$0xff] }
  0x31   :  { %338 = vmatpush.msrb.mxu3 %v195_v1  ;;  %319 = vmatpush.msrb.mxu2 %v178_v2  ;;  %v137_v40 = vld [vmem:[#allocation5 + $0x228] sm:$0xff]  ;;  %v154_v41 = vld [vmem:[#allocation5 + $0x2b0] sm:$0xff]  ;;  %v168_v42 = vld [vmem:[#allocation5 + $0x320] sm:$0xff] }
  0x32   :  { %279 = vmatpush.msrb.mxu0 %v146_v4  ;;  %298 = vmatpush.msrb.mxu1 %v163_v5  ;;  %v185_v43 = vld [vmem:[#allocation5 + $0x3a8] sm:$0xff]  ;;  %v62_v44 = vld [vmem:[#allocation2 + $0x10] sm:$0xff]  ;;  %v136_v45 = vld [vmem:[#allocation5 + $0x220] sm:$0xff] }
  0x33   :  { %320 = vmatpush.msrb.mxu2 %v177_v6  ;;  %339 = vmatpush.msrb.mxu3 %v194_v7  ;;  %v153_v46 = vld [vmem:[#allocation5 + $0x2a8] sm:$0xff]  ;;  %v167_v47 = vld [vmem:[#allocation5 + $0x318] sm:$0xff]  ;;  %v184_v48 = vld [vmem:[#allocation5 + $0x3a0] sm:$0xff] }
  0x34   :  { %280 = vmatpush.msrb.mxu0 %v145_v8  ;;  %299 = vmatpush.msrb.mxu1 %v162_v9  ;;  %v60_v49 = vld [vmem:[#allocation2] sm:$0xff]  ;;  %v63_v50 = vld [vmem:[#allocation2 + $0x18] sm:$0xff]  ;;  %v166_v53 = vld [vmem:[#allocation5 + $0x310] sm:$0xff] }
  0x35   :  { %321 = vmatpush.msrb.mxu2 %v176_v10  ;;  %340 = vmatpush.msrb.mxu3 %v193_v11  ;;  %v135_v51 = vld [vmem:[#allocation5 + $0x218] sm:$0xff]  ;;  %v152_v52 = vld [vmem:[#allocation5 + $0x2a0] sm:$0xff]  ;;  %v61_v55 = vld [vmem:[#allocation2 + $0x8] sm:$0xff] }
  0x36   :  { %281 = vmatpush.msrb.mxu0 %v144_v12  ;;  %300 = vmatpush.msrb.mxu1 %v161_v13  ;;  %v183_v54 = vld [vmem:[#allocation5 + $0x398] sm:$0xff]  ;;  %v134_v56 = vld [vmem:[#allocation5 + $0x210] sm:$0xff]  ;;  %v165_v58 = vld [vmem:[#allocation5 + $0x308] sm:$0xff] }
  0x37   :  { %322 = vmatpush.msrb.mxu2 %v175_v14  ;;  %341 = vmatpush.msrb.mxu3 %v192_v15  ;;  %v151_v57 = vld [vmem:[#allocation5 + $0x298] sm:$0xff]  ;;  %v182_v59 = vld [vmem:[#allocation5 + $0x390] sm:$0xff]  ;;  %v133_v60 = vld [vmem:[#allocation5 + $0x208] sm:$0xff] }
  0x38   :  { %282 = vmatpush.msrb.mxu0 %v143_v16  ;;  %301 = vmatpush.msrb.mxu1 %v160_v17  ;;  %v150_v61 = vld [vmem:[#allocation5 + $0x290] sm:$0xff]  ;;  %v164_v62 = vld [vmem:[#allocation5 + $0x300] sm:$0xff]  ;;  %v181_v63 = vld [vmem:[#allocation5 + $0x388] sm:$0xff] }
  0x39   :  { %323 = vmatpush.msrb.mxu2 %v174_v18  ;;  %342 = vmatpush.msrb.mxu3 %v191_v19  ;;  %v66_v0 = vld [vmem:[#allocation2 + $0x30] sm:$0xff]  ;;  %v132_v1 = vld [vmem:[#allocation5 + $0x200] sm:$0xff]  ;;  %v149_v2 = vld [vmem:[#allocation5 + $0x288] sm:$0xff] }
  0x3a   :  { %283 = vmatpush.msrb.mxu0 %v142_v20  ;;  %302 = vmatpush.msrb.mxu1 %v159_v21  ;;  %v180_v3 = vld [vmem:[#allocation5 + $0x380] sm:$0xff]  ;;  %v67_v5 = vld [vmem:[#allocation2 + $0x38] sm:$0xff]  ;;  %v65_v8 = vld [vmem:[#allocation2 + $0x28] sm:$0xff] }
  0x3b   :  { %324 = vmatpush.msrb.mxu2 %v173_v22  ;;  %343 = vmatpush.msrb.mxu3 %v190_v23  ;;  %v64_v4 = vld [vmem:[#allocation2 + $0x20] sm:$0xff]  ;;  %v374_v7 = vld [vmem:[#allocation7 + $0x78] sm:$0xff]  ;;  %v373_v9 = vld [vmem:[#allocation7 + $0x70] sm:$0xff] }
  0x3c   :  { %284 = vmatpush.msrb.mxu0 %v141_v24  ;;  %303 = vmatpush.msrb.mxu1 %v158_v25  ;;  %v148_v6 = vld [vmem:[#allocation5 + $0x280] sm:$0xff]  ;;  %v372_v10 = vld [vmem:[#allocation7 + $0x68] sm:$0xff]  ;;  %v370_v12 = vld [vmem:[#allocation7 + $0x58] sm:$0xff] }
  0x3d   :  { %325 = vmatpush.msrb.mxu2 %v172_v26  ;;  %344 = vmatpush.msrb.mxu3 %v189_v27  ;;  %v371_v11 = vld [vmem:[#allocation7 + $0x60] sm:$0xff]  ;;  %v369_v13 = vld [vmem:[#allocation7 + $0x50] sm:$0xff]  ;;  %v368_v14 = vld [vmem:[#allocation7 + $0x48] sm:$0xff] }
  0x3e   :  { %285 = vmatpush.msrb.mxu0 %v140_v28  ;;  %304 = vmatpush.msrb.mxu1 %v157_v29  ;;  %v367_v15 = vld [vmem:[#allocation7 + $0x40] sm:$0xff]  ;;  %v366_v16 = vld [vmem:[#allocation7 + $0x38] sm:$0xff]  ;;  %v365_v17 = vld [vmem:[#allocation7 + $0x30] sm:$0xff] }
  0x3f   :  { %326 = vmatpush.msrb.mxu2 %v171_v30  ;;  %345 = vmatpush.msrb.mxu3 %v188_v31  ;;  %v364_v18 = vld [vmem:[#allocation7 + $0x28] sm:$0xff]  ;;  %v363_v19 = vld [vmem:[#allocation7 + $0x20] sm:$0xff]  ;;  %v362_v20 = vld [vmem:[#allocation7 + $0x18] sm:$0xff] }
  0x40   :  { %286 = vmatpush.msrb.mxu0 %v139_v32  ;;  %305 = vmatpush.msrb.mxu1 %v156_v33  ;;  %v361_v21 = vld [vmem:[#allocation7 + $0x10] sm:$0xff]  ;;  %v360_v22 = vld [vmem:[#allocation7 + $0x8] sm:$0xff]  ;;  %v359_v23 = vld [vmem:[#allocation7] sm:$0xff] }
  0x41   :  { %327 = vmatpush.msrb.mxu2 %v170_v34  ;;  %346 = vmatpush.msrb.mxu3 %v187_v35  ;;  %v412_v24 = vld [vmem:[#allocation7 + $0xf8] sm:$0xff]  ;;  %v411_v25 = vld [vmem:[#allocation7 + $0xf0] sm:$0xff]  ;;  %v410_v26 = vld [vmem:[#allocation7 + $0xe8] sm:$0xff] }
  0x42   :  { %287 = vmatpush.msrb.mxu0 %v138_v36  ;;  %306 = vmatpush.msrb.mxu1 %v155_v37  ;;  %v409_v27 = vld [vmem:[#allocation7 + $0xe0] sm:$0xff]  ;;  %v408_v29 = vld [vmem:[#allocation7 + $0xd8] sm:$0xff]  ;;  %v407_v31 = vld [vmem:[#allocation7 + $0xd0] sm:$0xff] }
  0x43   :  { %328 = vmatpush.msrb.mxu2 %v169_v38  ;;  %347 = vmatpush.msrb.mxu3 %v186_v39  ;;  %v196_v28 = vld [vmem:[#allocation7 + $0x100] sm:$0xff]  ;;  %v406_v32 = vld [vmem:[#allocation7 + $0xc8] sm:$0xff]  ;;  %v404_v37 = vld [vmem:[#allocation7 + $0xb8] sm:$0xff] }
  0x44   :  { %288 = vmatpush.msrb.mxu0 %v137_v40  ;;  %307 = vmatpush.msrb.mxu1 %v154_v41  ;;  %v197_v30 = vperm.slane %v196_v28, 0  ;;  %v405_v35 = vld [vmem:[#allocation7 + $0xc0] sm:$0xff]  ;;  %v403_v40 = vld [vmem:[#allocation7 + $0xb0] sm:$0xff] }
  0x45   :  { %329 = vmatpush.msrb.mxu2 %v168_v42  ;;  %348 = vmatpush.msrb.mxu3 %v185_v43  ;;  %v402_v43 = vld [vmem:[#allocation7 + $0xa8] sm:$0xff] }
  0x46   :  { %254 = vmatmul.f32.vlgmr.msra.gmra.mxu2 %v62_v44  ;;  %289 = vmatpush.msrb.mxu0 %v136_v45  ;;  %v401_v45 = vld [vmem:[#allocation7 + $0xa0] sm:$0xff] }
  0x47   :  { %308 = vmatpush.msrb.mxu1 %v153_v46  ;;  %330 = vmatpush.msrb.mxu2 %v167_v47 }
  0x48   :  { %349 = vmatpush.msrb.mxu3 %v184_v48  ;;  %214 = vmatmul.f32.vlgmr.msra.gmra.mxu0 %v60_v49  ;;  %v400_v48 = vld [vmem:[#allocation7 + $0x98] sm:$0xff] }
  0x49   :  { %274 = vmatmul.f32.vlgmr.msra.gmra.mxu3 %v63_v50  ;;  %290 = vmatpush.msrb.mxu0 %v135_v51 }
  0x4a   :  { %309 = vmatpush.msrb.mxu1 %v152_v52  ;;  %331 = vmatpush.msrb.mxu2 %v166_v53 }
  0x4b   :  { %350 = vmatpush.msrb.mxu3 %v183_v54  ;;  %234 = vmatmul.f32.vlgmr.msra.gmra.mxu1 %v61_v55 }
  0x4c   :  { %291 = vmatpush.msrb.mxu0 %v134_v56  ;;  %310 = vmatpush.msrb.mxu1 %v151_v57  ;;  %v399_v56 = vld [vmem:[#allocation7 + $0x90] sm:$0xff]  ;;  %v398_v57 = vld [vmem:[#allocation7 + $0x88] sm:$0xff] }
  0x4d   :  { %332 = vmatpush.msrb.mxu2 %v165_v58  ;;  %351 = vmatpush.msrb.mxu3 %v182_v59  ;;  %v397_v58 = vld [vmem:[#allocation7 + $0x80] sm:$0xff]  ;;  %v375_v59 = vperm.slane %v196_v28, 1 }
  0x4e   :  { %292 = vmatpush.msrb.mxu0 %v133_v60  ;;  %311 = vmatpush.msrb.mxu1 %v150_v61 }
  0x4f   :  { %333 = vmatpush.msrb.mxu2 %v164_v62  ;;  %352 = vmatpush.msrb.mxu3 %v181_v63  ;;  %v413_v63 = vperm.slane %v196_v28, 2 }
  0x50   :  { %334 = vmatmul.f32.vlgmr.msrb.gmra.mxu2 %v66_v0  ;;  %293 = vmatpush.msrb.mxu0 %v132_v1 }
  0x51   :  { %312 = vmatpush.msrb.mxu1 %v149_v2  ;;  %353 = vmatpush.msrb.mxu3 %v180_v3 }
  0x52   :  { %294 = vmatmul.f32.vlgmr.msrb.gmra.mxu0 %v64_v4  ;;  %354 = vmatmul.f32.vlgmr.msrb.gmra.mxu3 %v67_v5 }
  0x53   :  { %313 = vmatpush.msrb.mxu1 %v148_v6  ;;  %376 = vmatpush.msra.mxu0 %v374_v7 }
  0x54   :  { %314 = vmatmul.f32.vlgmr.msrb.gmra.mxu1 %v65_v8 }
  0x55   :  { %377 = vmatpush.msra.mxu0 %v373_v9  ;;  %414 = vmatpush.msra.mxu1 %v412_v24 }
  0x57   :  { %378 = vmatpush.msra.mxu0 %v372_v10  ;;  %415 = vmatpush.msra.mxu1 %v411_v25 }
  0x59   :  { %379 = vmatpush.msra.mxu0 %v371_v11  ;;  %416 = vmatpush.msra.mxu1 %v410_v26 }
  0x5b   :  { %380 = vmatpush.msra.mxu0 %v370_v12  ;;  %417 = vmatpush.msra.mxu1 %v409_v27 }
  0x5d   :  { %381 = vmatpush.msra.mxu0 %v369_v13  ;;  %418 = vmatpush.msra.mxu1 %v408_v29 }
  0x5f   :  { %382 = vmatpush.msra.mxu0 %v368_v14  ;;  %419 = vmatpush.msra.mxu1 %v407_v31 }
  0x61   :  { %383 = vmatpush.msra.mxu0 %v367_v15  ;;  %420 = vmatpush.msra.mxu1 %v406_v32 }
  0x63   :  { %384 = vmatpush.msra.mxu0 %v366_v16  ;;  %421 = vmatpush.msra.mxu1 %v405_v35 }
  0x65   :  { %385 = vmatpush.msra.mxu0 %v365_v17  ;;  %422 = vmatpush.msra.mxu1 %v404_v37 }
  0x67   :  { %386 = vmatpush.msra.mxu0 %v364_v18  ;;  %423 = vmatpush.msra.mxu1 %v403_v40 }
  0x69   :  { %387 = vmatpush.msra.mxu0 %v363_v19  ;;  %424 = vmatpush.msra.mxu1 %v402_v43 }
  0x6b   :  { %388 = vmatpush.msra.mxu0 %v362_v20  ;;  %425 = vmatpush.msra.mxu1 %v401_v45 }
  0x6d   :  { %389 = vmatpush.msra.mxu0 %v361_v21  ;;  %426 = vmatpush.msra.mxu1 %v400_v48 }
  0x6f   :  { %390 = vmatpush.msra.mxu0 %v360_v22  ;;  %427 = vmatpush.msra.mxu1 %v399_v56 }
  0x71   :  { %391 = vmatpush.msra.mxu0 %v359_v23  ;;  %428 = vmatpush.msra.mxu1 %v398_v57 }
  0x73   :  { %429 = vmatpush.msra.mxu1 %v397_v58 }
  0xc5   :  { %v215_v33 = vpop.f32.mrf.mxu0 }
  0xc6   :  { %v216_v34 = vadd.f32 %v215_v33, %v197_v30 }
  0xc8   :  { %v235_v36 = vpop.f32.mrf.mxu1 }
  0xc9   :  { %v236_v38 = vadd.f32 %v235_v36, %v216_v34  ;;  %v255_v39 = vpop.f32.mrf.mxu2 }
  0xcb   :  { %v256_v41 = vadd.f32 %v255_v39, %v236_v38 }
  0xcc   :  { %v275_v42 = vpop.f32.mrf.mxu3 }
  0xcd   :  { %v276_v44 = vadd.f32 %v275_v42, %v256_v41 }
  0xcf   :  { %v295_v46 = vpop.f32.mrf.mxu0 }
  0xd0   :  { %v296_v47 = vadd.f32 %v295_v46, %v276_v44 }
  0xd1   :  { %v315_v49 = vpop.f32.mrf.mxu1 }
  0xd2   :  { %v316_v50 = vadd.f32 %v315_v49, %v296_v47 }
  0xd3   :  { %v335_v51 = vpop.f32.mrf.mxu2 }
  0xd4   :  { %v336_v52 = vadd.f32 %v335_v51, %v316_v50 }
  0xd5   :  { %v355_v53 = vpop.f32.mrf.mxu3 }
  0xd6   :  { %v356_v54 = vadd.f32 %v355_v53, %v336_v52 }
  0xd8   :  { %v358_v55 = vmax.f32 %v356_v54, 0.0 }
  0xda   :  { %392 = vmatmul.f32.vlgmr.msra.gmra.mxu0 %v358_v55 }
 0x157   :  { %v393_v60 = vpop.f32.mrf.mxu0 }
 0x158   :  { %v394_v61 = vadd.f32 %v393_v60, %v375_v59 }
 0x15a   :  { %v396_v62 = vmax.f32 %v394_v61, 0.0 }
 0x15c   :  { %430 = vmatmul.f32.vlgmr.msra.gmra.mxu1 %v396_v62 }
 0x1d9   :  { %v431_v0 = vpop.f32.mrf.mxu1 }
 0x1da   :  { %v432_v1 = vadd.f32 %v431_v0, %v413_v63 }
 0x1dc   :  { %434 = vst [vmem:[#allocation8] sm:$0xff] %v432_v1 }
 0x1dd   :  { %445 = dma.vmem_to_hbm [thread:$0]  %s441_s2, 128, %s443_s30, [#allocation4]  }
 0x1de   :  { %559 = dma.done.wait [#allocation4], 128  }
 0x1df   :  { %560 = vsyncadd [#allocation4], 4294967168 }
 0x1e0   :  { %450 = vsyncpa [#allocation3], 1 }
 0x1e1   :  { %451 = vsyncpa [#allocation6], 1 }
 0x1e2   :  { %452 = vsyncpa [#allocation4], 1 }

</bundles_post_ra>
